<compile_context>
chip_gen: v5e
topology: v5e:2x2
jax: 0.10.0
libtpu: 0.0.40
codegen_flags: <defaults>
</compile_context>

<pallas_src>
import math

import jax
import jax.numpy as jnp
from jax import lax
from jax.experimental import pallas as pl
from jax.experimental.pallas import tpu as pltpu

TWO_PI = 2.0 * math.pi


def _pos_emb_kernel(x_ref, w_ref, o_ref):
    # x_ref: (TB, 1) f32 time values for this batch tile
    # w_ref: (1, D) f32 where D = 1 + 2*half_dim and
    #        w_full = [0, weights, weights]  (column 0 is a dummy slot for "x")
    # o_ref: (TB, D) output tile
    x = x_ref[...].astype(jnp.float32)                     # (TB, 1)
    w = w_ref[...].astype(jnp.float32)                     # (1, D), resident across grid
    half_dim = (w.shape[1] - 1) // 2

    # Single broadcasted pass over the (TB, D) tile; same op order as the
    # PyTorch reference: (x * w) * 2*pi.
    theta = (x * w) * TWO_PI                               # (TB, D)
    s = jnp.sin(theta)                                     # EUP
    c = jnp.cos(theta)                                     # EUP

    col = lax.broadcasted_iota(jnp.int32, theta.shape, 1)  # column index
    xb = jnp.broadcast_to(x, theta.shape)
    # col 0 -> raw x ; cols 1..half_dim -> sin ; cols half_dim+1.. -> cos
    out = jnp.where(col == 0, xb, jnp.where(col <= half_dim, s, c))
    o_ref[...] = out.astype(o_ref.dtype)


def learned_sinusoidal_pos_emb(x, weights):
    """x: (B,), weights: (half_dim,). Returns (B, 2*half_dim + 1)."""
    B = x.shape[0]
    half_dim = weights.shape[0]
    D = 1 + 2 * half_dim
    out_dtype = x.dtype

    # Parameter layout plumbing (O(D), done once per call in plain JAX):
    # pack [0, weights, weights] so the kernel does one lane-dense broadcasted
    # multiply instead of building/concatenating sub-blocks in VMEM.
    w32 = weights.astype(jnp.float32)
    w_full = jnp.concatenate(
        [jnp.zeros((1,), jnp.float32), w32, w32]
    ).reshape(1, D)

    x2 = x.reshape(B, 1).astype(jnp.float32)

    # Batch tile: full B when small (block == array dim is always legal),
    # otherwise 512 rows (multiple of 8 sublanes) so large B gets real
    # double-buffered pipelining while staying tiny in VMEM on all of
    # v5e / v6e / v7x.
    tb = B if B <= 512 else 512
    grid = (pl.cdiv(B, tb),)

    cost = pl.CostEstimate(
        flops=6 * B * D,              # 2 muls + compares/selects per element
        transcendentals=2 * B * D,    # sin + cos per element
        bytes_accessed=int(B * 4 + D * 4 + B * D * x2.dtype.itemsize),
    )

    out = pl.pallas_call(
        _pos_emb_kernel,
        out_shape=jax.ShapeDtypeStruct((B, D), out_dtype),
        grid_spec=pltpu.PrefetchScalarGridSpec(
            num_scalar_prefetch=0,
            grid=grid,
            in_specs=[
                pl.BlockSpec((tb, 1), lambda i: (i, 0)),   # batch tile of x
                pl.BlockSpec((1, D), lambda i: (0, 0)),    # constant, stays resident
            ],
            out_specs=pl.BlockSpec((tb, D), lambda i: (i, 0)),
        ),
        compiler_params=pltpu.CompilerParams(
            # Single independent grid axis; "parallel" lets dual-TC chips (v7x)
            # shard batch tiles across cores, no-op on single-TC v5e/v6e.
            dimension_semantics=("parallel",),
        ),
        cost_estimate=cost,
    )(x2, w_full)

    return out


if __name__ == "__main__":
    key = jax.random.PRNGKey(0)
    B, dim = 8, 32
    assert dim % 2 == 0
    half_dim = dim // 2

    kx, kw = jax.random.split(key)
    x = jax.random.normal(kx, (B,), dtype=jnp.float32)              # timesteps
    weights = jax.random.normal(kw, (half_dim,), dtype=jnp.float32) # torch.randn(half_dim)

    y = learned_sinusoidal_pos_emb(x, weights)
    y = jax.block_until_ready(y)

    # Pure-JAX reference (mirrors the PyTorch forward).
    freqs = x[:, None] * weights[None, :] * (2.0 * math.pi)
    ref = jnp.concatenate([x[:, None], jnp.sin(freqs), jnp.cos(freqs)], axis=-1)

    assert y.shape == (B, dim + 1)
    assert jnp.allclose(y, ref, atol=1e-5, rtol=1e-5)

    print("KERNEL_OK")
</pallas_src>

<mosaic_0001>
module attributes {stable_mosaic.version = 11 : i64} {
  func.func @_pos_emb_kernel(%arg0: i32, %arg1: memref<8x1xf32, #tpu.memory_space<vmem>>, %arg2: memref<1x33xf32, #tpu.memory_space<vmem>>, %arg3: memref<8x33xf32, #tpu.memory_space<vmem>>) attributes {dimension_semantics = [#tpu.dimension_semantics<parallel>], iteration_bounds = array<i64: 1>, scalar_prefetch = 0 : i64, scratch_operands = 0 : i64, tpu.core_type = #tpu.core_type<tc>, window_params = [{transform_indices = @transform_0, window_bounds = array<i64: 8, 1>}, {pipeline_mode = #tpu.pipeline_mode<synchronous>, transform_indices = @transform_1, window_bounds = array<i64: 1, 33>}, {transform_indices = @transform_2, window_bounds = array<i64: 8, 33>}]} {
    %c0 = arith.constant 0 : index
    %c0_0 = arith.constant 0 : index
    %0 = vector.load %arg1[%c0, %c0_0] : memref<8x1xf32, #tpu.memory_space<vmem>>, vector<8x1xf32>
    %c0_1 = arith.constant 0 : index
    %c0_2 = arith.constant 0 : index
    %1 = vector.load %arg2[%c0_1, %c0_2] : memref<1x33xf32, #tpu.memory_space<vmem>>, vector<1x33xf32>
    %2 = vector.broadcast %0 : vector<8x1xf32> to vector<8x33xf32>
    %3 = vector.broadcast %1 : vector<1x33xf32> to vector<8x33xf32>
    %4 = arith.mulf %2, %3 : vector<8x33xf32>
    %cst = arith.constant 6.28318548 : f32
    %5 = vector.broadcast %cst : f32 to vector<8x33xf32>
    %6 = arith.mulf %4, %5 : vector<8x33xf32>
    %7 = math.sin %6 : vector<8x33xf32>
    %8 = math.cos %6 : vector<8x33xf32>
    %9 = tpu.iota {dimensions = array<i32: 1>} : vector<8x33xi32>
    %10 = vector.shape_cast %0 : vector<8x1xf32> to vector<8x1xf32>
    %11 = vector.broadcast %10 : vector<8x1xf32> to vector<8x33xf32>
    %c0_i32 = arith.constant 0 : i32
    %12 = vector.broadcast %c0_i32 : i32 to vector<8x33xi32>
    %13 = arith.cmpi eq, %9, %12 : vector<8x33xi32>
    %c16_i32 = arith.constant 16 : i32
    %14 = vector.broadcast %c16_i32 : i32 to vector<8x33xi32>
    %15 = arith.cmpi sle, %9, %14 : vector<8x33xi32>
    %16 = arith.select %15, %7, %8 : vector<8x33xi1>, vector<8x33xf32>
    %17 = arith.select %13, %11, %16 : vector<8x33xi1>, vector<8x33xf32>
    %c0_3 = arith.constant 0 : index
    %c0_4 = arith.constant 0 : index
    %18 = vector.load %arg3[%c0_3, %c0_4] : memref<8x33xf32, #tpu.memory_space<vmem>>, vector<8x33xf32>
    tpu.vector_store %arg3[%c0_3, %c0_4], %17 {strides = array<i32>} : memref<8x33xf32, #tpu.memory_space<vmem>>, vector<8x33xf32>,
    return
  }
  func.func @transform_0(%arg0: i32) -> (i32, i32) {
    %c0_i32 = arith.constant 0 : i32
    %c0_i32_0 = arith.constant 0 : i32
    return %arg0, %c0_i32 : i32, i32
  }
  func.func @transform_1(%arg0: i32) -> (i32, i32) {
    %c0_i32 = arith.constant 0 : i32
    %c0_i32_0 = arith.constant 0 : i32
    %c0_i32_1 = arith.constant 0 : i32
    return %c0_i32, %c0_i32_0 : i32, i32
  }
  func.func @transform_2(%arg0: i32) -> (i32, i32) {
    %c0_i32 = arith.constant 0 : i32
    %c0_i32_0 = arith.constant 0 : i32
    return %arg0, %c0_i32 : i32, i32
  }
}

</mosaic_0001>

<bundles_post_ra>
// kernel: tpu_custom_call.1
= control target key start
LH: loop header
LB: loop body
LE: loop exit
PB: predicated region body
PF: predicated region fallthrough
CT: control target
= control target key end

     0   :  { %v399_v1 = vmov 0   ;;  %s498_s0 = inlined_call_operand.vmem [shape: f32[8,1], index: 0, kind: input, shape index: {}]   ;;  %s499_s1 = inlined_call_operand.vmem [shape: f32[1,33], index: 1, kind: input, shape index: {}]   ;;  %s500_s2 = inlined_call_operand.hbm [shape: f32[8,33], index: 2, kind: output, shape index: {}]  }
   0x1   :  { %v12_v0 = vld [vmem:[%s498_s0] sm:$0xff]  ;;  %371 = vset.pattern.permute.xlu0 %v399_v1 }
   0x2   :  { %16 = vperm.xlu0 %371, %v12_v0  }
   0x3   :  { %7 = vsyncpa [#allocation3], 0  ;;  %v372_v2 = vld [vmem:[%s499_s1] ss:$0 sm:$0xff]  ;;  %v400_v17 = vmov 683565275  }
   0x4   :  { %v401_v19 = vmov 2475754826   ;;  %v402_v22 = vmov 2131351028   ;;  %v403_v25 = vmov 2102212464  }
   0x5   :  { %v404_v28 = vmov 920167782   ;;  %v405_v31 = vmov 1326507024   ;;  %s406_s0 = smov [#allocation2]   ;;  %s348_s15 = sshll.u32 %s500_s2, 4  ;;  %s349_s15 = int_to_ptr.hbm [resolvable:$true] %s348_s15 }
   0x6   :  { %s346_s1 = sshll.u32 %s406_s0, 4  ;;  %s347_s1 = int_to_ptr.vmem [resolvable:$true] %s346_s1 }
  0x74   :  { %v429_v3 = vpop.permute.xlu0 %16 }
  0x75   :  { %v22_v4 = vmul.f32 %v372_v2, %v429_v3 }
  0x77   :  { %v432_v5 = vmul.f32 6.2831855, %v22_v4 }
  0x79   :  { %v27_v6 = vand.u32 2139095040, %v432_v5  ;;  %v24_v9 = vand.u32 2147483647, %v432_v5  ;;  %vm26_vm12 = vcmp.lt.s32.totalorder %v432_v5, 0 }
  0x7b   :  { %v28_v7 = vshrl.u32 %v27_v6, 23  ;;  %v31_v11 = vand.u32 8388607, %v24_v9  ;;  %vm25_vm13 = vcmp.le.f32.partialorder %v24_v9, 0.7853982 }
  0x7d   :  { %v357_v8 = vadd.s32 4294967169, %v28_v7  ;;  %v32_v15 = vor.u32 8388608, %v31_v11 }
  0x7f   :  { %v34_v10 = vadd.s32 1, %v357_v8  ;;  %v449_v38 = vshll.u32 %v32_v15, 8 }
  0x81   :  { %vm35_vm0 = vcmp.gt.s32.totalorder %v34_v10, 0  ;;  %v73_v47 = vand.u32 65535, %v449_v38  ;;  %v74_v48 = vshrl.u32 %v449_v38, 16 }
  0x82   :  { %v36_v12 = vsel %vm35_vm0, %v34_v10, 0 }
  0x83   :  { %v38_v13 = vand.u32 31, %v36_v12  ;;  %v440_v16 = vshrl.u32 %v36_v12, 5 }
  0x85   :  { %v438_v14 = vsub.s32 32, %v38_v13  ;;  %v41_v18 = vshll.u32 %v400_v17, %v38_v13  ;;  %v44_v20 = vshll.u32 %v401_v19, %v38_v13  ;;  %v47_v24 = vshll.u32 %v402_v22, %v38_v13 }
  0x86   :  { %v50_v27 = vshll.u32 %v403_v25, %v38_v13  ;;  %v53_v30 = vshll.u32 %v404_v28, %v38_v13  ;;  %vm56_vm1 = vcmp.lt.s32.totalorder %v440_v16, 1  ;;  %vm59_vm2 = vcmp.lt.s32.totalorder %v440_v16, 4 }
  0x87   :  { %v42_v21 = vshrl.u32 %v401_v19, %v438_v14  ;;  %v45_v23 = vshrl.u32 %v402_v22, %v438_v14  ;;  %v48_v26 = vshrl.u32 %v403_v25, %v438_v14  ;;  %v51_v29 = vshrl.u32 %v404_v28, %v438_v14 }
  0x88   :  { %v54_v32 = vshrl.u32 %v405_v31, %v438_v14  ;;  %vm58_vm3 = vcmp.lt.s32.totalorder %v440_v16, 3  ;;  %vm57_vm4 = vcmp.lt.s32.totalorder %v440_v16, 2  ;;  %v40_v13 = vshrl.u32 %v400_v17, %v438_v14 }
  0x89   :  { %v43_v33 = vor.u32 %v42_v21, %v41_v18  ;;  %v46_v34 = vor.u32 %v45_v23, %v44_v20  ;;  %v49_v35 = vor.u32 %v48_v26, %v47_v24  ;;  %v52_v36 = vor.u32 %v51_v29, %v50_v27 }
  0x8a   :  { %v55_v37 = vor.u32 %v54_v32, %v53_v30 }
  0x8b   :  { %v64_v39 = vsel %vm56_vm1, %v43_v33, %v46_v34  ;;  %v68_v40 = vsel %vm56_vm1, %v46_v34, %v49_v35  ;;  %v65_v41 = vsel %vm59_vm2, %v52_v36, 920167782  ;;  %v61_v10 = vsel %vm59_vm2, %v49_v35, 2102212464 }
  0x8c   :  { %v69_v42 = vsel %vm59_vm2, %v55_v37, 1326507024  ;;  %v66_v43 = vsel %vm58_vm3, %v49_v35, %v65_v41  ;;  %v60_v22 = vsel %vm56_vm1, %v40_v13, %v43_v33  ;;  %v62_v23 = vsel %vm58_vm3, %v46_v34, %v61_v10 }
  0x8d   :  { %v70_v44 = vsel %vm58_vm3, %v52_v36, %v69_v42  ;;  %v67_v45 = vsel %vm57_vm4, %v64_v39, %v66_v43  ;;  %v63_v14 = vsel %vm57_vm4, %v60_v22, %v62_v23 }
  0x8e   :  { %v71_v46 = vsel %vm57_vm4, %v68_v40, %v70_v44  ;;  %v97_v51 = vand.u32 65535, %v67_v45  ;;  %v98_v52 = vshrl.u32 %v67_v45, 16  ;;  %v117_v30 = vmul.u32 %v449_v38, %v63_v14 }
  0x8f   :  { %v75_v49 = vand.u32 65535, %v71_v46  ;;  %v76_v50 = vshrl.u32 %v71_v46, 16 }
  0x90   :  { %v100_v55 = vmul.u32 %v98_v52, %v73_v47  ;;  %v101_v56 = vmul.u32 %v97_v51, %v74_v48  ;;  %v99_v60 = vmul.u32 %v97_v51, %v73_v47  ;;  %v102_v0 = vmul.u32 %v98_v52, %v74_v48 }
  0x91   :  { %v78_v53 = vmul.u32 %v76_v50, %v73_v47  ;;  %v79_v54 = vmul.u32 %v75_v49, %v74_v48  ;;  %v77_v57 = vmul.u32 %v75_v49, %v73_v47  ;;  %v80_v59 = vmul.u32 %v76_v50, %v74_v48 }
  0x92   :  { %v103_v61 = vshll.u32 %v100_v55, 16  ;;  %v105_v4 = vshll.u32 %v101_v56, 16  ;;  %v104_v20 = vshrl.u32 %v100_v55, 16  ;;  %v106_v26 = vshrl.u32 %v101_v56, 16 }
  0x93   :  { %v81_v58 = vshll.u32 %v78_v53, 16  ;;  %v83_v62 = vshll.u32 %v79_v54, 16  ;;  %v82_v15 = vshrl.u32 %v78_v53, 16  ;;  %v84_v24 = vshrl.u32 %v79_v54, 16 }
  0x94   :  { %vm107_vm6 = vc.u32 %v99_v60, %v103_v61  ;;  %v109_v6 = vadd.s32 %v103_v61, %v99_v60 }
  0x95   :  { %vm85_vm5 = vc.u32 %v77_v57, %v81_v58  ;;  %v87_v63 = vadd.s32 %v81_v58, %v77_v57  ;;  %v108_v8 = vsel %vm107_vm6, 1, %v399_v1  ;;  %vm167_vm6 = vweird.f32 %v432_v5 }
  0x96   :  { %v86_v2 = vsel %vm85_vm5, 1, %v399_v1  ;;  %v110_v12 = vadd.s32 %v108_v8, %v102_v0  ;;  %vm111_vm8 = vc.u32 %v109_v6, %v105_v4  ;;  %v113_v29 = vadd.s32 %v109_v6, %v105_v4 }
  0x97   :  { %v88_v7 = vadd.s32 %v86_v2, %v80_v59  ;;  %vm89_vm7 = vc.u32 %v87_v63, %v83_v62  ;;  %v112_v19 = vsel %vm111_vm8, 1, %v399_v1  ;;  %v333_v4 = vlaneseq }
  0x98   :  { %v90_v11 = vsel %vm89_vm7, 1, %v399_v1  ;;  %v114_v21 = vadd.s32 %v112_v19, %v110_v12  ;;  %vm339_vm7 = vcmask 269312  }
  0x99   :  { %v92_v18 = vadd.s32 %v90_v11, %v88_v7  ;;  %v334_v9 = vand.u32 127, %v333_v4 }
  0x9a   :  { %v115_v27 = vadd.s32 %v114_v21, %v104_v20 }
  0x9b   :  { %v93_v25 = vadd.s32 %v92_v18, %v82_v15  ;;  %vm336_vm14 = vcmp.le.s32.totalorder %v334_v9, 16  ;;  %vm335_vm5 = vcmp.eq.s32.totalorder %v334_v9, 0 }
  0x9c   :  { %v116_v17 = vadd.s32 %v115_v27, %v106_v26 }
  0x9d   :  { %v94_v28 = vadd.s32 %v93_v25, %v84_v24 }
  0x9e   :  { %v120_v1 = vadd.s32 1, %v116_v17 }
  0x9f   :  { %vm119_vm9 = vc.u32 %v94_v28, %v113_v29  ;;  %v118_v16 = vadd.s32 %v113_v29, %v94_v28 }
  0xa0   :  { %v121_v31 = vsel %vm119_vm9, %v120_v1, %v116_v17 }
  0xa1   :  { %v122_v32 = vadd.s32 %v121_v31, %v117_v30 }
  0xa3   :  { %v123_v33 = vadd.s32 536870912, %v122_v32 }
  0xa5   :  { %v124_v35 = vshrl.u32 %v123_v33, 30 }
  0xa7   :  { %v125_v36 = vshll.u32 %v124_v35, 30  ;;  %v148_v55 = vsub.s32 4, %v124_v35 }
  0xa9   :  { %v126_v34 = vsub.s32 %v122_v32, %v125_v36  ;;  %v149_v60 = vsel %vm26_vm12, %v148_v55, %v124_v35 }
  0xaa   :  { %v151_v63 = vsel %vm25_vm13, 0, %v149_v60 }
  0xab   :  { %vm127_vm10 = vcmp.lt.s32.totalorder %v126_v34, 0  ;;  %v128_v37 = vsub.s32 0, %v126_v34  ;;  %v168_v8 = vadd.s32 3, %v151_v63  ;;  %v323_v15 = vand.u32 3, %v151_v63 }
  0xad   :  { %v129_v39 = vsel %vm127_vm10, %v128_v37, %v126_v34  ;;  %v169_v18 = vand.u32 3, %v168_v8  ;;  %vm324_vm15 = vcmp.lt.s32.totalorder %v323_v15, 2  ;;  %vm325_vm0 = vcmp.eq.s32.totalorder %v323_v15, 0 }
  0xae   :  { %v130_v40 = vclz %v129_v39  ;;  %vm328_vm4 = vcmp.eq.s32.totalorder %v323_v15, 2 }
  0xaf   :  { %vm170_vm1 = vcmp.lt.s32.totalorder %v169_v18, 2  ;;  %vm171_vm2 = vcmp.eq.s32.totalorder %v169_v18, 0  ;;  %vm174_vm3 = vcmp.eq.s32.totalorder %v169_v18, 2 }
  0xb0   :  { %v358_v41 = vadd.s32 4294967294, %v130_v40 }
  0xb2   :  { %vm359_vm11 = vcmp.lt.s32.totalorder %v358_v41, 0 }
  0xb3   :  { %v133_v42 = vsel %vm359_vm11, 0, %v358_v41 }
  0xb4   :  { %v134_v43 = vsub.s32 32, %v133_v42  ;;  %v138_v44 = vsub.s32 4294967266, %v133_v42  ;;  %v135_v45 = vshll.u32 %v126_v34, %v133_v42 }
  0xb6   :  { %v136_v46 = vshrl.u32 %v118_v16, %v134_v43  ;;  %v139_v47 = vadd.s32 127, %v138_v44 }
  0xb8   :  { %v137_v38 = vor.u32 %v136_v46, %v135_v45  ;;  %v140_v48 = vshll.u32 %v139_v47, 23 }
  0xba   :  { %v141_v49 = vor.u32 4788187, %v140_v48  ;;  %v144_v51 = vcvt.s32.f32 %v137_v38 }
  0xbc   :  { %v142_v50 = vand.u32 2147483647, %v141_v49 }
  0xbe   :  { %v145_v52 = vmul.f32 %v144_v51, %v142_v50 }
  0xc0   :  { %v146_v53 = vxor.u32 2147483648, %v145_v52 }
  0xc2   :  { %v147_v54 = vsel %vm26_vm12, %v146_v53, %v145_v52 }
  0xc3   :  { %v150_v56 = vsel %vm25_vm13, %v432_v5, %v147_v54 }
  0xc4   :  { %v152_v57 = vmul.f32 %v150_v56, %v150_v56 }
  0xc6   :  { %v153_v58 = vmul.f32 -0.001358992, %v152_v57  ;;  %v160_v59 = vmul.f32 -0.00019511016, %v152_v57 }
  0xc8   :  { %v154_v61 = vadd.f32 0.041655596, %v153_v58  ;;  %v161_v62 = vadd.f32 0.008332121, %v160_v59 }
  0xca   :  { %v155_v0 = vmul.f32 %v154_v61, %v152_v57  ;;  %v162_v2 = vmul.f32 %v161_v62, %v152_v57 }
  0xcc   :  { %v156_v6 = vadd.f32 -0.4999988, %v155_v0  ;;  %v163_v7 = vadd.f32 -0.16666654, %v162_v2 }
  0xce   :  { %v157_v10 = vmul.f32 %v156_v6, %v152_v57  ;;  %v164_v11 = vmul.f32 %v163_v7, %v152_v57 }
  0xd0   :  { %v158_v12 = vadd.f32 1.0, %v157_v10  ;;  %v165_v13 = vadd.f32 1.0, %v164_v11 }
  0xd2   :  { %v166_v19 = vmul.f32 %v165_v13, %v150_v56  ;;  %v175_v20 = vxor.u32 2147483648, %v158_v12 }
  0xd4   :  { %v172_v21 = vxor.u32 2147483648, %v166_v19  ;;  %v176_v23 = vsel %vm174_vm3, %v175_v20, %v166_v19  ;;  %v330_v25 = vsel %vm328_vm4, %v175_v20, %v166_v19 }
  0xd6   :  { %v173_v22 = vsel %vm171_vm2, %v158_v12, %v172_v21  ;;  %v327_v24 = vsel %vm325_vm0, %v158_v12, %v172_v21 }
  0xd7   :  { %v177_v26 = vsel %vm170_vm1, %v173_v22, %v176_v23  ;;  %v331_v27 = vsel %vm324_vm15, %v327_v24, %v330_v25 }
  0xd8   :  { %v178_v28 = vsel %vm167_vm6, nan, %v177_v26  ;;  %v332_v29 = vsel %vm167_vm6, nan, %v331_v27 }
  0xd9   :  { %v337_v14 = vsel %vm336_vm14, %v178_v28, %v332_v29 }
  0xda   :  { %v338_v17 = vsel %vm335_vm5, %v429_v3, %v337_v14 }
  0xdb   :  { %340 = vst.msk [vmem:[#allocation2] sm:$0xff] %vm339_vm7, %v338_v17 }
  0xdc   :  { %351 = dma.vmem_to_hbm [thread:$0]  %s347_s1, 128, %s349_s15, [#allocation3]  }
  0xdd   :  { %397 = dma.done.wait [#allocation3], 128  }
  0xde   :  { %398 = vsyncadd [#allocation3], 4294967168 }
  0xdf   :  { %356 = vsyncpa [#allocation3], 1 }

</bundles_post_ra>
